<compile_context>
chip_gen: v7x
topology: tpu7x:2x2x1
jax: 0.10.0
libtpu: 0.0.40
codegen_flags: <defaults>
</compile_context>

<pallas_src>
import functools

import jax
import jax.numpy as jnp
from jax.experimental import pallas as pl
from jax.experimental.pallas import tpu as pltpu

HIDDEN = 128


def _round_up(n, m):
    return ((n + m - 1) // m) * m


def actor_kernel(x_ref, w1_ref, b1_ref, w2_ref, b2_ref, o_ref):
    # x:  [TB, S]   streamed activations (bf16 on the HBM side)
    # w1: [S, H], b1: [1, H], w2: [H, A], b2: [1, A]  -- VMEM-resident (constant index_map)
    # o:  [TB, A]  unpadded output (A-wide store; no padded columns)
    x = x_ref[...].astype(jnp.float32)  # cast at load (VPU filler under the DMA bound)

    h = jnp.dot(x, w1_ref[...], preferred_element_type=jnp.float32) + b1_ref[...]
    h = jnp.maximum(h, 0.0)  # ReLU (f32 on the VPU)

    logits = jnp.dot(h, w2_ref[...], preferred_element_type=jnp.float32) + b2_ref[...]

    # Numerically stable softmax over the real action dim.
    m = jnp.max(logits, axis=-1, keepdims=True)
    e = jnp.exp(logits - m)
    denom = jnp.sum(e, axis=-1, keepdims=True)
    o_ref[...] = (e / denom).astype(o_ref.dtype)  # exact divide: free in a mem-bound kernel


@functools.partial(jax.jit, static_argnames=("block_b", "stream_dtype"))
def actor_forward(x, w1, b1, w2, b2, *, block_b=1024, stream_dtype=jnp.bfloat16):
    """Actor forward for a batch of states x: [B, state_dim] -> probs [B, action_dim]."""
    B, S = x.shape
    H = w1.shape[1]
    A = w2.shape[1]

    # bf16 on the streamed activation path; all math stays f32 inside the kernel.
    xs = x.astype(stream_dtype)

    # Pad the batch to a sublane multiple only when needed (tiny copy, rare).
    B_pad = _round_up(max(B, 8), 8)
    if B_pad != B:
        xs = jnp.pad(xs, ((0, B_pad - B), (0, 0)))

    # Batch tiling: large tiles amortize the ~0.35us/grid-step overhead, but keep
    # >= 2 grid steps so ("parallel",) can shard across v7x's 2 TensorCores.
    n_steps = max(2, pl.cdiv(B_pad, block_b))
    TB = _round_up(pl.cdiv(B_pad, n_steps), 8)
    grid = (pl.cdiv(B_pad, TB),)

    out = pl.pallas_call(
        actor_kernel,
        out_shape=jax.ShapeDtypeStruct((B_pad, A), jnp.float32),
        grid=grid,
        in_specs=[
            pl.BlockSpec((TB, S), lambda i: (i, 0)),  # streamed activation tiles
            pl.BlockSpec((S, H), lambda i: (0, 0)),   # VMEM-resident weights (DMA'd once)
            pl.BlockSpec((1, H), lambda i: (0, 0)),
            pl.BlockSpec((H, A), lambda i: (0, 0)),
            pl.BlockSpec((1, A), lambda i: (0, 0)),
        ],
        out_specs=pl.BlockSpec((TB, A), lambda i: (i, 0)),  # unpadded, A-wide output
        compiler_params=pltpu.CompilerParams(
            dimension_semantics=("parallel",),  # v7x: shard batch across 2 TCs
        ),
    )(xs, w1, b1, w2, b2)

    return out[:B] if B_pad != B else out


def init_actor_params(key, state_dim, action_dim, hidden=HIDDEN):
    """One-time param prep (weights stored [in, out]); mimics torch.nn.Linear init."""
    k1, k2, k3, k4 = jax.random.split(key, 4)
    bound1 = 1.0 / jnp.sqrt(jnp.float32(state_dim))
    bound2 = 1.0 / jnp.sqrt(jnp.float32(hidden))
    w1 = jax.random.uniform(k1, (state_dim, hidden), jnp.float32, -bound1, bound1)
    b1 = jax.random.uniform(k2, (1, hidden), jnp.float32, -bound1, bound1)
    w2 = jax.random.uniform(k3, (hidden, action_dim), jnp.float32, -bound2, bound2)
    b2 = jax.random.uniform(k4, (1, action_dim), jnp.float32, -bound2, bound2)
    return w1, b1, w2, b2


if __name__ == "__main__":
    key = jax.random.PRNGKey(0)
    state_dim = 16
    action_dim = 8
    hidden = HIDDEN
    batch = 64  # small demo batch; the same code handles ~1k+ rollout batches

    pkey, xkey = jax.random.split(key)
    w1, b1, w2, b2 = init_actor_params(pkey, state_dim, action_dim, hidden)
    x = jax.random.normal(xkey, (batch, state_dim), jnp.float32)

    probs = actor_forward(x, w1, b1, w2, b2)
    jax.block_until_ready(probs)

    # Pure-JAX reference (tolerance accounts for the bf16 activation stream).
    ref = jax.nn.softmax(jnp.maximum(x @ w1 + b1, 0.0) @ w2 + b2, axis=-1)
    assert probs.shape == (batch, action_dim)
    assert bool(jnp.all(jnp.isfinite(probs)))
    assert jnp.allclose(jnp.sum(probs, axis=-1), 1.0, atol=1e-3)
    assert jnp.allclose(probs, ref, atol=1e-2)

    # Non-8-aligned small batch exercises the (tiny) pad/slice path.
    probs_small = actor_forward(x[:10], w1, b1, w2, b2)
    jax.block_until_ready(probs_small)
    assert probs_small.shape == (10, action_dim)
    assert jnp.allclose(probs_small, ref[:10], atol=1e-2)

    print("KERNEL_OK")
</pallas_src>

<mosaic_0001>
module attributes {stable_mosaic.version = 11 : i64} {
  func.func @actor_kernel(%arg0: i32, %arg1: memref<32x16xbf16, #tpu.memory_space<vmem>>, %arg2: memref<16x128xf32, #tpu.memory_space<vmem>>, %arg3: memref<1x128xf32, #tpu.memory_space<vmem>>, %arg4: memref<128x8xf32, #tpu.memory_space<vmem>>, %arg5: memref<1x8xf32, #tpu.memory_space<vmem>>, %arg6: memref<32x8xf32, #tpu.memory_space<vmem>>) attributes {dimension_semantics = [#tpu.dimension_semantics<parallel>], iteration_bounds = array<i64: 2>, scalar_prefetch = 0 : i64, scratch_operands = 0 : i64, tpu.core_type = #tpu.core_type<tc>, window_params = [{transform_indices = @transform_0, window_bounds = array<i64: 32, 16>}, {pipeline_mode = #tpu.pipeline_mode<synchronous>, transform_indices = @transform_1, window_bounds = array<i64: 16, 128>}, {pipeline_mode = #tpu.pipeline_mode<synchronous>, transform_indices = @transform_2, window_bounds = array<i64: 1, 128>}, {pipeline_mode = #tpu.pipeline_mode<synchronous>, transform_indices = @transform_3, window_bounds = array<i64: 128, 8>}, {pipeline_mode = #tpu.pipeline_mode<synchronous>, transform_indices = @transform_4, window_bounds = array<i64: 1, 8>}, {transform_indices = @transform_5, window_bounds = array<i64: 32, 8>}]} {
    %c0 = arith.constant 0 : index
    %c0_0 = arith.constant 0 : index
    %0 = vector.load %arg1[%c0, %c0_0] : memref<32x16xbf16, #tpu.memory_space<vmem>>, vector<32x16xbf16>
    %1 = arith.extf %0 : vector<32x16xbf16> to vector<32x16xf32>
    %c0_1 = arith.constant 0 : index
    %c0_2 = arith.constant 0 : index
    %2 = vector.load %arg2[%c0_1, %c0_2] : memref<16x128xf32, #tpu.memory_space<vmem>>, vector<16x128xf32>
    %cst = arith.constant dense<0.000000e+00> : vector<32x128xf32>
    %3 = tpu.matmul %1, %2, %cst {dimension_numbers = #tpu.dot_dimension_numbers<[1], [0], [0], [1], [0, 0, 1, 1], [], []>} : vector<32x16xf32>, vector<16x128xf32>, vector<32x128xf32> -> vector<32x128xf32>
    %c0_3 = arith.constant 0 : index
    %c0_4 = arith.constant 0 : index
    %4 = vector.load %arg3[%c0_3, %c0_4] : memref<1x128xf32, #tpu.memory_space<vmem>>, vector<1x128xf32>
    %5 = vector.broadcast %4 : vector<1x128xf32> to vector<32x128xf32>
    %6 = arith.addf %3, %5 : vector<32x128xf32>
    %cst_5 = arith.constant 0.000000e+00 : f32
    %7 = vector.broadcast %cst_5 : f32 to vector<32x128xf32>
    %8 = arith.maximumf %6, %7 : vector<32x128xf32>
    %c0_6 = arith.constant 0 : index
    %c0_7 = arith.constant 0 : index
    %9 = vector.load %arg4[%c0_6, %c0_7] : memref<128x8xf32, #tpu.memory_space<vmem>>, vector<128x8xf32>
    %cst_8 = arith.constant dense<0.000000e+00> : vector<32x8xf32>
    %10 = tpu.matmul %8, %9, %cst_8 {dimension_numbers = #tpu.dot_dimension_numbers<[1], [0], [0], [1], [0, 0, 1, 1], [], []>} : vector<32x128xf32>, vector<128x8xf32>, vector<32x8xf32> -> vector<32x8xf32>
    %c0_9 = arith.constant 0 : index
    %c0_10 = arith.constant 0 : index
    %11 = vector.load %arg5[%c0_9, %c0_10] : memref<1x8xf32, #tpu.memory_space<vmem>>, vector<1x8xf32>
    %12 = vector.broadcast %11 : vector<1x8xf32> to vector<32x8xf32>
    %13 = arith.addf %10, %12 : vector<32x8xf32>
    %cst_11 = arith.constant dense<0xFF800000> : vector<32xf32>
    %14 = vector.multi_reduction <maximumf>, %13, %cst_11 [1] : vector<32x8xf32> to vector<32xf32>
    %15 = vector.shape_cast %14 : vector<32xf32> to vector<32x1xf32>
    %16 = vector.broadcast %15 : vector<32x1xf32> to vector<32x8xf32>
    %17 = arith.subf %13, %16 : vector<32x8xf32>
    %18 = math.exp %17 : vector<32x8xf32>
    %cst_12 = arith.constant dense<0.000000e+00> : vector<32xf32>
    %19 = vector.multi_reduction <add>, %18, %cst_12 [1] : vector<32x8xf32> to vector<32xf32>
    %20 = vector.shape_cast %19 : vector<32xf32> to vector<32x1xf32>
    %21 = vector.broadcast %20 : vector<32x1xf32> to vector<32x8xf32>
    %22 = arith.divf %18, %21 : vector<32x8xf32>
    %c0_13 = arith.constant 0 : index
    %c0_14 = arith.constant 0 : index
    %23 = vector.load %arg6[%c0_13, %c0_14] : memref<32x8xf32, #tpu.memory_space<vmem>>, vector<32x8xf32>
    tpu.vector_store %arg6[%c0_13, %c0_14], %22 {strides = array<i32>} : memref<32x8xf32, #tpu.memory_space<vmem>>, vector<32x8xf32>,
    return
  }
  func.func @transform_0(%arg0: i32) -> (i32, i32) {
    %c0_i32 = arith.constant 0 : i32
    %c0_i32_0 = arith.constant 0 : i32
    return %arg0, %c0_i32 : i32, i32
  }
  func.func @transform_1(%arg0: i32) -> (i32, i32) {
    %c0_i32 = arith.constant 0 : i32
    %c0_i32_0 = arith.constant 0 : i32
    %c0_i32_1 = arith.constant 0 : i32
    return %c0_i32, %c0_i32_0 : i32, i32
  }
  func.func @transform_2(%arg0: i32) -> (i32, i32) {
    %c0_i32 = arith.constant 0 : i32
    %c0_i32_0 = arith.constant 0 : i32
    %c0_i32_1 = arith.constant 0 : i32
    return %c0_i32, %c0_i32_0 : i32, i32
  }
  func.func @transform_3(%arg0: i32) -> (i32, i32) {
    %c0_i32 = arith.constant 0 : i32
    %c0_i32_0 = arith.constant 0 : i32
    %c0_i32_1 = arith.constant 0 : i32
    return %c0_i32, %c0_i32_0 : i32, i32
  }
  func.func @transform_4(%arg0: i32) -> (i32, i32) {
    %c0_i32 = arith.constant 0 : i32
    %c0_i32_0 = arith.constant 0 : i32
    %c0_i32_1 = arith.constant 0 : i32
    return %c0_i32, %c0_i32_0 : i32, i32
  }
  func.func @transform_5(%arg0: i32) -> (i32, i32) {
    %c0_i32 = arith.constant 0 : i32
    %c0_i32_0 = arith.constant 0 : i32
    return %arg0, %c0_i32 : i32, i32
  }
}

</mosaic_0001>

<bundles_post_ra>
// kernel: actor_forward.1
= control target key start
LH: loop header
LB: loop body
LE: loop exit
PB: predicated region body
PF: predicated region fallthrough
CT: control target
= control target key end

     0   :  { %s758_s18 = smov 0   ;;  %s855_s0 = inlined_call_operand.vmem [shape: bf16[64,16], index: 0, kind: input, shape index: {}]   ;;  %s856_s1 = inlined_call_operand.vmem [shape: f32[16,128], index: 1, kind: input, shape index: {}]   ;;  %s857_s2 = inlined_call_operand.vmem [shape: f32[1,128], index: 2, kind: input, shape index: {}]   ;;  %s858_s3 = inlined_call_operand.vmem [shape: f32[128,8], index: 3, kind: input, shape index: {}]   ;;  %s859_s4 = inlined_call_operand.vmem [shape: f32[1,8], index: 4, kind: input, shape index: {}]   ;;  %s860_s5 = inlined_call_operand.vmem [shape: f32[64,8], index: 5, kind: output, shape index: {}]  }
   0x1 LB: > { %s560_s19 = sadd.s32 4294967295, %s726_s18   ;;  %p564_p0 = scmp.ge.s32.totalorder %s726_s18, 1  ;;  %s726_s18 = sphi %s758_s18, %s15_s18  }
   0x2   : > { %p188_p1 = scmp.lt.s32.totalorder %s726_s18, 3 }
   0x4   : > { %p189_p2 = pnand %p564_p0, %p188_p1 }
   0x5   : > { %v236_v0 = vld [vmem:[%s856_s1] sm:$0xff] (!%p189_p2)  ;;  %v237_v1 = vld [vmem:[%s856_s1 + $0x8] sm:$0xff] (!%p189_p2)  ;;  %s565_s24 = sshll.u32 (!%p189_p2), %s560_s19, 2  ;;  %v349_v5 = vld [vmem:[%s858_s3 + $0x10] sm:$0xff] (!%p189_p2)  ;;  %vm245_vm0 = vcmask (!%p189_p2), 130048   ;;  %vm455_vm1 = vcmask (!%p189_p2), 64512  }
   0x6   : > { %192 = sbr.rel (%p189_p2) target bundleno = 777 (0x309), region = 40  ;;  %v347_v2 = vld [vmem:[%s858_s3] sm:$0xff] (!%p189_p2)  ;;  %v660_v3 = vpack.c.bf16 (!%p189_p2), %v237_v1, %v236_v0  ;;  %p217_p3 = scmp.lt.s32.totalorder (!%p189_p2), %s565_s24, 7  ;;  %v348_v4 = vld [vmem:[%s858_s3 + $0x8] sm:$0xff] (!%p189_p2)  ;;  %v350_v6 = vld [vmem:[%s858_s3 + $0x18] sm:$0xff] (!%p189_p2) }
   0x7   : > { %v664_v7 = vpack.c.bf16 (!%p189_p2), %v348_v4, %v347_v2  ;;  %v668_v8 = vpack.c.bf16 (!%p189_p2), %v350_v6, %v349_v5  ;;  %v351_v9 = vld [vmem:[%s858_s3 + $0x20] sm:$0xff] (!%p189_p2)  ;;  %v352_v10 = vld [vmem:[%s858_s3 + $0x28] sm:$0xff] (!%p189_p2)  ;;  %v353_v12 = vld [vmem:[%s858_s3 + $0x30] sm:$0xff] (!%p189_p2) }
   0x8   : > { %661 = vmatprep.subr.bf16.mxu0 (!%p189_p2), %v660_v3  ;;  %v672_v11 = vpack.c.bf16 (!%p189_p2), %v352_v10, %v351_v9  ;;  %v354_v15 = vld [vmem:[%s858_s3 + $0x38] sm:$0xff] (!%p189_p2)  ;;  %v355_v21 = vld [vmem:[%s858_s3 + $0x40] sm:$0xff] (!%p189_p2)  ;;  %v356_v22 = vld [vmem:[%s858_s3 + $0x48] sm:$0xff] (!%p189_p2) }
   0x9   : > { %663 = vmatpush3.bf16.msra.mxu0 (!%p189_p2), %v660_v3  ;;  %665 = vmatprep.subr.bf16.mxu1 (!%p189_p2), %v664_v7  ;;  %v676_v19 = vpack.c.bf16 (!%p189_p2), %v354_v15, %v353_v12  ;;  %v680_v23 = vpack.c.bf16 (!%p189_p2), %v356_v22, %v355_v21  ;;  %v357_v24 = vld [vmem:[%s858_s3 + $0x50] sm:$0xff] (!%p189_p2)  ;;  %v358_v25 = vld [vmem:[%s858_s3 + $0x58] sm:$0xff] (!%p189_p2)  ;;  %v359_v27 = vld [vmem:[%s858_s3 + $0x60] sm:$0xff] (!%p189_p2) }
   0xa   : > { %667 = vmatpush3.bf16.msra.mxu1 (!%p189_p2), %v664_v7  ;;  %v684_v26 = vpack.c.bf16 (!%p189_p2), %v358_v25, %v357_v24  ;;  %v360_v28 = vld [vmem:[%s858_s3 + $0x68] sm:$0xff] (!%p189_p2)  ;;  %v361_v30 = vld [vmem:[%s858_s3 + $0x70] sm:$0xff] (!%p189_p2)  ;;  %v362_v31 = vld [vmem:[%s858_s3 + $0x78] sm:$0xff] (!%p189_p2) }
   0xb   : > { %669 = vmatprep.subr.bf16.mxu1 (!%p189_p2), %v668_v8  ;;  %v688_v29 = vpack.c.bf16 (!%p189_p2), %v360_v28, %v359_v27  ;;  %v692_v32 = vpack.c.bf16 (!%p189_p2), %v362_v31, %v361_v30  ;;  %v569_v33 = vld [vmem:[%s857_s2] ss:$0 sm:$0xff] (!%p189_p2) }
   0xc   : > { %v574_v46 = vld [vmem:[%s859_s4] ss:$0 sm:$0xff] (!%p189_p2) }
   0xd   : > { %s862_s24 = smov (!%p217_p3, %s565_s24), 7 }
   0xe   : > { %s566_s12 = sshll.u32 %s862_s24, 2  ;;  %671 = vmatpush3.bf16.msra.mxu1 %v668_v8  ;;  %s568_s17 = sshll.u32 %s862_s24, 3 }
   0xf   : > { %s220_s15 = scalar_lea.vmem %s855_s0, %s566_s12  ;;  %673 = vmatprep.subr.bf16.mxu1 %v672_v11  ;;  %s226_s21 = scalar_lea.vmem %s860_s5, %s568_s17 }
  0x10   : > { %v578_v13 = vld [vmem:[%s220_s15] sm:$0xff]   ;;  %v585_v14 = vld [vmem:[%s220_s15 + $0x8] sm:$0xff]  }
  0x11   : > { %v579_v16 = vunpack.c.l.bf16 %v578_v13  ;;  %v580_v17 = vunpack.c.h.bf16 %v578_v13  ;;  %v583_v18 = vunpack.c.l.bf16 %v585_v14  ;;  %v584_v20 = vunpack.c.h.bf16 %v585_v14 }
  0x12   : > { %675 = vmatpush3.bf16.msra.mxu1 %v672_v11 }
  0x13   : > { %616 = vmatprep.mubr.msk.f32.mxu0 %vm245_vm0, %v579_v16  ;;  %677 = vmatprep.subr.bf16.mxu1 %v676_v19 }
  0x14   : > { %617 = vmatmul.mubr.msk.f32.vlgmr.msra.gmra.mrb[0].mxu0 %vm245_vm0, %v580_v17 }
  0x15   : > { %619 = vmatprep.mubr.msk.f32.mxu0 %vm245_vm0, %v583_v18 }
  0x16   : > { %679 = vmatpush3.bf16.msra.mxu1 %v676_v19 }
  0x17   : > { %681 = vmatprep.subr.bf16.mxu1 %v680_v23 }
  0x18   : > { %620 = vmatmul.mubr.msk.f32.gmra.mrb[2].mxu0 %vm245_vm0, %v584_v20 }
  0x1a   : > { %683 = vmatpush3.bf16.msra.mxu1 %v680_v23 }
  0x1b   : > { %685 = vmatprep.subr.bf16.mxu1 %v684_v26 }
  0x1e   : > { %687 = vmatpush3.bf16.msra.mxu1 %v684_v26 }
  0x1f   : > { %689 = vmatprep.subr.bf16.mxu1 %v688_v29 }
  0x22   : > { %691 = vmatpush3.bf16.msra.mxu1 %v688_v29 }
  0x23   : > { %693 = vmatprep.subr.bf16.mxu1 %v692_v32 }
  0x26   : > { %695 = vmatpush3.bf16.msra.mxu1 %v692_v32 }
  0xe7   : > { %v618_v34 = vpop.f32.mrb[0].mxu0 }
  0xe8   : > { %v330_v35 = vadd.f32 %v618_v34, %v569_v33  ;;  %v324_v36 = vpop.f32.mrb[1].mxu0 }
  0xe9   : > { %v325_v37 = vadd.f32 %v569_v33, %v324_v36 }
  0xea   : > { %v344_v40 = vmax.f32 %v330_v35, 0.0 }
  0xeb   : > { %v621_v38 = vpop.f32.mrb[2].mxu0  ;;  %v343_v39 = vmax.f32 %v325_v37, 0.0 }
  0xec   : > { %v340_v41 = vadd.f32 %v621_v38, %v569_v33  ;;  %v334_v42 = vpop.f32.mrb[3].mxu0 }
  0xed   : > { %v335_v43 = vadd.f32 %v569_v33, %v334_v42  ;;  %654 = vmatprep.mubr.f32.mxu1 %v343_v39 }
  0xee   : > { %655 = vmatmul.mubr.f32.vlgmr.msra.gmra.mrb[0].mxu1 %v344_v40  ;;  %v346_v45 = vmax.f32 %v340_v41, 0.0 }
  0xef   : > { %v345_v44 = vmax.f32 %v335_v43, 0.0 }
  0xf1   : > { %657 = vmatprep.mubr.f32.mxu1 %v345_v44 }
  0xf2   : > { %658 = vmatmul.mubr.f32.gmra.mrb[2].mxu1 %v346_v45 }
 0x1c1   : > { %v656_v47 = vpop.f32.mrb[0].mxu1 }
 0x1c2   : > { %v436_v48 = vpop.f32.mrb[1].mxu1  ;;  %v442_v50 = vadd.f32 %v656_v47, %v574_v46 }
 0x1c3   : > { %v437_v49 = vadd.f32 %v574_v46, %v436_v48 }
 0x1c4   : > { %v459_v57 = vsel %vm455_vm1, %v442_v50, -inf }
 0x1c5   : > { %v659_v51 = vpop.f32.mrb[2].mxu1  ;;  %v456_v52 = vsel %vm455_vm1, %v437_v49, -inf }
 0x1c6   : > { %v446_v53 = vpop.f32.mrb[3].mxu1  ;;  %457 = vmax.xlane.f32.xlu0 %v456_v52  ;;  %v452_v55 = vadd.f32 %v659_v51, %v574_v46 }
 0x1c7   : > { %v447_v54 = vadd.f32 %v574_v46, %v446_v53 }
 0x1c8   : > { %v465_v58 = vsel %vm455_vm1, %v452_v55, -inf }
 0x1c9   : > { %v462_v56 = vsel %vm455_vm1, %v447_v54, -inf }
 0x1ca   : > { %463 = vmax.xlane.f32.xlu1 %v462_v56  ;;  %460 = vmax.xlane.f32.xlu0 %v459_v57 }
 0x1ce   : > { %466 = vmax.xlane.f32.xlu1 %v465_v58 }
 0x253   : > { %v458_v59 = vpop.xlane.xlu0 %457 }
 0x254   : > { %v468_v60 = vsub.f32 %v437_v49, %v458_v59 }
 0x256   : > { %v472_v61 = vmul.f32 1.442695, %v468_v60 }
 0x257   : > { %v464_v62 = vpop.xlane.xlu1 %463  ;;  %v461_v63 = vpop.xlane.xlu0 %460 }
 0x258   : > { %704 = vpow2.f32 %v472_v61  ;;  %v470_v0 = vsub.f32 %v447_v54, %v464_v62  ;;  %v469_v1 = vsub.f32 %v442_v50, %v461_v63 }
 0x25a   : > { %v476_v2 = vmul.f32 1.442695, %v470_v0  ;;  %v474_v3 = vmul.f32 1.442695, %v469_v1 }
 0x25b   : > { %v467_v4 = vpop.xlane.xlu1 %466 }
 0x25c   : > { %706 = vpow2.f32 %v476_v2  ;;  %v471_v5 = vsub.f32 %v452_v55, %v467_v4 }
 0x25d   : > { %708 = vpow2.f32 %v474_v3 }
 0x25e   : > { %v478_v6 = vmul.f32 1.442695, %v471_v5 }
 0x260   : > { %710 = vpow2.f32 %v478_v6 }
 0x262   : > { %v705_v7 = vpop.eup %704 }
 0x263   : > { %v480_v8 = vsel %vm455_vm1, %v705_v7, 0.0 }
 0x264   : > { %481 = vadd.xlane.f32.xlu0 %v480_v8 }
 0x266   : > { %v707_v9 = vpop.eup %706 }
 0x267   : > { %v709_v10 = vpop.eup %708  ;;  %v486_v11 = vsel %vm455_vm1, %v707_v9, 0.0 }
 0x268   : > { %487 = vadd.xlane.f32.xlu0 %v486_v11  ;;  %v483_v12 = vsel %vm455_vm1, %v709_v10, 0.0 }
 0x269   : > { %484 = vadd.xlane.f32.xlu1 %v483_v12 }
 0x26a   : > { %v711_v13 = vpop.eup %710 }
 0x26b   : > { %v489_v14 = vsel %vm455_vm1, %v711_v13, 0.0 }
 0x26d   : > { %490 = vadd.xlane.f32.xlu1 %v489_v14 }
 0x2f1   : > { %v482_v15 = vpop.xlane.xlu0 %481 }
 0x2f2   : > { %712 = vrcp.f32 %v482_v15 }
 0x2f5   : > { %v488_v16 = vpop.xlane.xlu0 %487 }
 0x2f6   : > { %v485_v17 = vpop.xlane.xlu1 %484  ;;  %714 = vrcp.f32 %v488_v16 }
 0x2f7   : > { %716 = vrcp.f32 %v485_v17 }
 0x2fa   : > { %v491_v18 = vpop.xlane.xlu1 %490 }
 0x2fb   : > { %718 = vrcp.f32 %v491_v18 }
 0x2fc   : > { %v713_v19 = vpop.eup %712 }
 0x2fd   : > { %v493_v20 = vmul.f32 %v713_v19, %v705_v7 }
 0x2ff   : > { %500 = vst.msk [vmem:[%s226_s21] sm:$0xff] %vm455_vm1, %v493_v20 }
 0x300   : > { %v715_v21 = vpop.eup %714 }
 0x301   : > { %v717_v22 = vpop.eup %716  ;;  %v497_v23 = vmul.f32 %v715_v21, %v707_v9 }
 0x302   : > { %v495_v24 = vmul.f32 %v717_v22, %v709_v10 }
 0x303   : > { %502 = vst.msk [vmem:[%s226_s21 + $0x10] sm:$0xff] %vm455_vm1, %v497_v23 }
 0x304   : > { %501 = vst.msk [vmem:[%s226_s21 + $0x8] sm:$0xff] %vm455_vm1, %v495_v24 }
 0x305   : > { %v719_v25 = vpop.eup %718 }
 0x306   : > { %v499_v26 = vmul.f32 %v719_v25, %v711_v13 }
 0x308   : > { %503 = vst.msk [vmem:[%s226_s21 + $0x18] sm:$0xff] %vm455_vm1, %v499_v26 }
 0x309 PF: > { %s15_s18 = sadd.s32 1, %s726_s18  }
 0x30a   : > { %p12_p4 = scmp.ge.s32.totalorder %s15_s18, 4  }
 0x30c   :  { %14 = sbr.rel (!%p12_p4) target bundleno = 1 (0x1), region = 70 }

</bundles_post_ra>
